<compile_context>
chip_gen: v5e
topology: v5e:2x2
jax: 0.10.0
libtpu: 0.0.40
codegen_flags: <defaults>
</compile_context>

<pallas_src>
import math
import jax
import jax.numpy as jnp
from jax.experimental import pallas as pl
from jax.experimental.pallas import tpu as pltpu


def value_mlp_kernel(x_ref, w1_ref, b1_ref, w2_ref, b2_ref,
                     w3_ref, b3_ref, wh_ref, bh_ref, out_ref):
    """Fused 3-hidden-layer tanh MLP + linear value head for one batch tile."""
    x = x_ref[...]
    h = jnp.tanh(
        jnp.dot(x, w1_ref[...], preferred_element_type=jnp.float32) + b1_ref[...])
    h = jnp.tanh(
        jnp.dot(h, w2_ref[...], preferred_element_type=jnp.float32) + b2_ref[...])
    h = jnp.tanh(
        jnp.dot(h, w3_ref[...], preferred_element_type=jnp.float32) + b3_ref[...])
    # Value head (out_features = 1): VPU multiply + XLU lane reduce instead of
    # an N=1 MXU matmul. wh_ref is a [1, H] row vector, bh_ref is [1, 1].
    v = jnp.sum(h * wh_ref[...], axis=-1, keepdims=True) + bh_ref[...]
    out_ref[...] = v.astype(out_ref.dtype)


def value_forward(x, params, tile_b=512):
    """Run the fused Value-MLP Pallas kernel.

    x: [B, num_inputs] float32
    params: dict with w1/w2/w3 as [in, out], b1/b2/b3 as [1, out],
            wh as [1, num_hidden] (row vector), bh as [1, 1].
    returns: [B, 1] float32 state values.
    """
    B, F = x.shape
    H = params["w1"].shape[1]
    tile_b = min(tile_b, B)          # single full-array tile for small batches
    grid = (pl.cdiv(B, tile_b),)

    # x / out tiled over the batch; weights pinned to block (0, 0) -> resident
    # in VMEM across all grid iterations (no re-DMA).
    x_spec = pl.BlockSpec((tile_b, F), lambda i: (i, 0))
    out_spec = pl.BlockSpec((tile_b, 1), lambda i: (i, 0))

    def pinned(shape):
        return pl.BlockSpec(shape, lambda i: (0, 0))

    in_specs = [
        x_spec,
        pinned(params["w1"].shape), pinned(params["b1"].shape),
        pinned(params["w2"].shape), pinned(params["b2"].shape),
        pinned(params["w3"].shape), pinned(params["b3"].shape),
        pinned(params["wh"].shape), pinned(params["bh"].shape),
    ]

    # Advisory cost estimate for XLA's scheduler.
    flops = 2 * B * (F * H + 2 * H * H + H)
    transcendentals = 3 * B * H
    weight_bytes = sum(int(params[k].size) * 4 for k in
                       ("w1", "b1", "w2", "b2", "w3", "b3", "wh", "bh"))
    bytes_accessed = B * F * 4 + weight_bytes + B * 1 * 4
    cost = pl.CostEstimate(flops=flops, transcendentals=transcendentals,
                           bytes_accessed=bytes_accessed)

    return pl.pallas_call(
        value_mlp_kernel,
        out_shape=jax.ShapeDtypeStruct((B, 1), jnp.float32),
        grid=grid,
        in_specs=in_specs,
        out_specs=out_spec,
        compiler_params=pltpu.CompilerParams(
            dimension_semantics=("parallel",)),
        cost_estimate=cost,
    )(x, params["w1"], params["b1"], params["w2"], params["b2"],
      params["w3"], params["b3"], params["wh"], params["bh"])


def init_value_params(key, num_inputs, num_hidden=24):
    """Init matching torch.nn.Linear defaults (U(-1/sqrt(fan_in), +)).

    value_head weight is scaled by 0.1 and its bias zeroed, mirroring
    `self.value_head.weight.data.mul_(0.1); self.value_head.bias.data.mul_(0.0)`.
    Hidden weights are [in, out]; the value-head weight is stored as a
    [1, num_hidden] row vector for the in-kernel VPU reduction.
    """
    def linear(key, fan_in, fan_out, w_scale=1.0, zero_bias=False):
        kw, kb = jax.random.split(key)
        bound = 1.0 / math.sqrt(fan_in)
        w = jax.random.uniform(kw, (fan_in, fan_out), jnp.float32, -bound, bound)
        b = jax.random.uniform(kb, (1, fan_out), jnp.float32, -bound, bound)
        w = w * w_scale
        if zero_bias:
            b = jnp.zeros_like(b)
        return w, b

    k1, k2, k3, k4 = jax.random.split(key, 4)
    w1, b1 = linear(k1, num_inputs, num_hidden)
    w2, b2 = linear(k2, num_hidden, num_hidden)
    w3, b3 = linear(k3, num_hidden, num_hidden)
    wh, bh = linear(k4, num_hidden, 1, w_scale=0.1, zero_bias=True)
    wh = wh.reshape(1, num_hidden)      # row vector for VPU reduce
    bh = bh.reshape(1, 1)
    return {"w1": w1, "b1": b1, "w2": w2, "b2": b2,
            "w3": w3, "b3": b3, "wh": wh, "bh": bh}


def value_forward_ref(x, p):
    """Pure-JAX reference for correctness checking."""
    h = jnp.tanh(x @ p["w1"] + p["b1"])
    h = jnp.tanh(h @ p["w2"] + p["b2"])
    h = jnp.tanh(h @ p["w3"] + p["b3"])
    return jnp.sum(h * p["wh"], axis=-1, keepdims=True) + p["bh"]


# TODO(synk): training (RMSprop + MSELoss + DataLoader loop) and
# calculate_action_grad (autograd w.r.t. the action slice) are host-side /
# optimizer logic outside the forward pass and are not implemented as kernels.

if __name__ == "__main__":
    key = jax.random.PRNGKey(0)
    k_param, k_x = jax.random.split(key)

    batch = 64           # small demo batch; tile_b=16 exercises a 4-step grid
    num_inputs = 16
    num_hidden = 24

    params = init_value_params(k_param, num_inputs, num_hidden)
    x = jax.random.normal(k_x, (batch, num_inputs), dtype=jnp.float32)

    out = value_forward(x, params, tile_b=16)
    out = jax.block_until_ready(out)

    ref = value_forward_ref(x, params)
    assert out.shape == (batch, 1), out.shape
    assert jnp.allclose(out, ref, atol=1e-5, rtol=1e-5), (out, ref)

    print("KERNEL_OK")
</pallas_src>

<mosaic_0001>
module attributes {stable_mosaic.version = 11 : i64} {
  func.func @value_mlp_kernel(%arg0: i32, %arg1: memref<16x16xf32, #tpu.memory_space<vmem>>, %arg2: memref<16x24xf32, #tpu.memory_space<vmem>>, %arg3: memref<1x24xf32, #tpu.memory_space<vmem>>, %arg4: memref<24x24xf32, #tpu.memory_space<vmem>>, %arg5: memref<1x24xf32, #tpu.memory_space<vmem>>, %arg6: memref<24x24xf32, #tpu.memory_space<vmem>>, %arg7: memref<1x24xf32, #tpu.memory_space<vmem>>, %arg8: memref<1x24xf32, #tpu.memory_space<vmem>>, %arg9: memref<1x1xf32, #tpu.memory_space<vmem>>, %arg10: memref<16x1xf32, #tpu.memory_space<vmem>>) attributes {dimension_semantics = [#tpu.dimension_semantics<parallel>], iteration_bounds = array<i64: 4>, scalar_prefetch = 0 : i64, scratch_operands = 0 : i64, tpu.core_type = #tpu.core_type<tc>, window_params = [{transform_indices = @transform_0, window_bounds = array<i64: 16, 16>}, {pipeline_mode = #tpu.pipeline_mode<synchronous>, transform_indices = @transform_1, window_bounds = array<i64: 16, 24>}, {pipeline_mode = #tpu.pipeline_mode<synchronous>, transform_indices = @transform_2, window_bounds = array<i64: 1, 24>}, {pipeline_mode = #tpu.pipeline_mode<synchronous>, transform_indices = @transform_3, window_bounds = array<i64: 24, 24>}, {pipeline_mode = #tpu.pipeline_mode<synchronous>, transform_indices = @transform_4, window_bounds = array<i64: 1, 24>}, {pipeline_mode = #tpu.pipeline_mode<synchronous>, transform_indices = @transform_5, window_bounds = array<i64: 24, 24>}, {pipeline_mode = #tpu.pipeline_mode<synchronous>, transform_indices = @transform_6, window_bounds = array<i64: 1, 24>}, {pipeline_mode = #tpu.pipeline_mode<synchronous>, transform_indices = @transform_7, window_bounds = array<i64: 1, 24>}, {pipeline_mode = #tpu.pipeline_mode<synchronous>, transform_indices = @transform_8, window_bounds = array<i64: 1, 1>}, {transform_indices = @transform_9, window_bounds = array<i64: 16, 1>}]} {
    %c0 = arith.constant 0 : index
    %c0_0 = arith.constant 0 : index
    %0 = vector.load %arg1[%c0, %c0_0] : memref<16x16xf32, #tpu.memory_space<vmem>>, vector<16x16xf32>
    %c0_1 = arith.constant 0 : index
    %c0_2 = arith.constant 0 : index
    %1 = vector.load %arg2[%c0_1, %c0_2] : memref<16x24xf32, #tpu.memory_space<vmem>>, vector<16x24xf32>
    %cst = arith.constant dense<0.000000e+00> : vector<16x24xf32>
    %2 = tpu.matmul %0, %1, %cst {dimension_numbers = #tpu.dot_dimension_numbers<[1], [0], [0], [1], [0, 0, 1, 1], [], []>} : vector<16x16xf32>, vector<16x24xf32>, vector<16x24xf32> -> vector<16x24xf32>
    %c0_3 = arith.constant 0 : index
    %c0_4 = arith.constant 0 : index
    %3 = vector.load %arg3[%c0_3, %c0_4] : memref<1x24xf32, #tpu.memory_space<vmem>>, vector<1x24xf32>
    %4 = vector.broadcast %3 : vector<1x24xf32> to vector<16x24xf32>
    %5 = arith.addf %2, %4 : vector<16x24xf32>
    %6 = math.tanh %5 : vector<16x24xf32>
    %c0_5 = arith.constant 0 : index
    %c0_6 = arith.constant 0 : index
    %7 = vector.load %arg4[%c0_5, %c0_6] : memref<24x24xf32, #tpu.memory_space<vmem>>, vector<24x24xf32>
    %cst_7 = arith.constant dense<0.000000e+00> : vector<16x24xf32>
    %8 = tpu.matmul %6, %7, %cst_7 {dimension_numbers = #tpu.dot_dimension_numbers<[1], [0], [0], [1], [0, 0, 1, 1], [], []>} : vector<16x24xf32>, vector<24x24xf32>, vector<16x24xf32> -> vector<16x24xf32>
    %c0_8 = arith.constant 0 : index
    %c0_9 = arith.constant 0 : index
    %9 = vector.load %arg5[%c0_8, %c0_9] : memref<1x24xf32, #tpu.memory_space<vmem>>, vector<1x24xf32>
    %10 = vector.broadcast %9 : vector<1x24xf32> to vector<16x24xf32>
    %11 = arith.addf %8, %10 : vector<16x24xf32>
    %12 = math.tanh %11 : vector<16x24xf32>
    %c0_10 = arith.constant 0 : index
    %c0_11 = arith.constant 0 : index
    %13 = vector.load %arg6[%c0_10, %c0_11] : memref<24x24xf32, #tpu.memory_space<vmem>>, vector<24x24xf32>
    %cst_12 = arith.constant dense<0.000000e+00> : vector<16x24xf32>
    %14 = tpu.matmul %12, %13, %cst_12 {dimension_numbers = #tpu.dot_dimension_numbers<[1], [0], [0], [1], [0, 0, 1, 1], [], []>} : vector<16x24xf32>, vector<24x24xf32>, vector<16x24xf32> -> vector<16x24xf32>
    %c0_13 = arith.constant 0 : index
    %c0_14 = arith.constant 0 : index
    %15 = vector.load %arg7[%c0_13, %c0_14] : memref<1x24xf32, #tpu.memory_space<vmem>>, vector<1x24xf32>
    %16 = vector.broadcast %15 : vector<1x24xf32> to vector<16x24xf32>
    %17 = arith.addf %14, %16 : vector<16x24xf32>
    %18 = math.tanh %17 : vector<16x24xf32>
    %c0_15 = arith.constant 0 : index
    %c0_16 = arith.constant 0 : index
    %19 = vector.load %arg8[%c0_15, %c0_16] : memref<1x24xf32, #tpu.memory_space<vmem>>, vector<1x24xf32>
    %20 = vector.broadcast %19 : vector<1x24xf32> to vector<16x24xf32>
    %21 = arith.mulf %18, %20 : vector<16x24xf32>
    %cst_17 = arith.constant dense<0.000000e+00> : vector<16xf32>
    %22 = vector.multi_reduction <add>, %21, %cst_17 [1] : vector<16x24xf32> to vector<16xf32>
    %23 = vector.shape_cast %22 : vector<16xf32> to vector<16x1xf32>
    %c0_18 = arith.constant 0 : index
    %c0_19 = arith.constant 0 : index
    %24 = vector.load %arg9[%c0_18, %c0_19] : memref<1x1xf32, #tpu.memory_space<vmem>>, vector<1x1xf32>
    %25 = vector.broadcast %24 : vector<1x1xf32> to vector<16x1xf32>
    %26 = arith.addf %23, %25 : vector<16x1xf32>
    %c0_20 = arith.constant 0 : index
    %c0_21 = arith.constant 0 : index
    %27 = vector.load %arg10[%c0_20, %c0_21] : memref<16x1xf32, #tpu.memory_space<vmem>>, vector<16x1xf32>
    tpu.vector_store %arg10[%c0_20, %c0_21], %26 {strides = array<i32>} : memref<16x1xf32, #tpu.memory_space<vmem>>, vector<16x1xf32>,
    return
  }
  func.func @transform_0(%arg0: i32) -> (i32, i32) {
    %c0_i32 = arith.constant 0 : i32
    %c0_i32_0 = arith.constant 0 : i32
    return %arg0, %c0_i32 : i32, i32
  }
  func.func @transform_1(%arg0: i32) -> (i32, i32) {
    %c0_i32 = arith.constant 0 : i32
    %c0_i32_0 = arith.constant 0 : i32
    %c0_i32_1 = arith.constant 0 : i32
    return %c0_i32, %c0_i32_0 : i32, i32
  }
  func.func @transform_2(%arg0: i32) -> (i32, i32) {
    %c0_i32 = arith.constant 0 : i32
    %c0_i32_0 = arith.constant 0 : i32
    %c0_i32_1 = arith.constant 0 : i32
    return %c0_i32, %c0_i32_0 : i32, i32
  }
  func.func @transform_3(%arg0: i32) -> (i32, i32) {
    %c0_i32 = arith.constant 0 : i32
    %c0_i32_0 = arith.constant 0 : i32
    %c0_i32_1 = arith.constant 0 : i32
    return %c0_i32, %c0_i32_0 : i32, i32
  }
  func.func @transform_4(%arg0: i32) -> (i32, i32) {
    %c0_i32 = arith.constant 0 : i32
    %c0_i32_0 = arith.constant 0 : i32
    %c0_i32_1 = arith.constant 0 : i32
    return %c0_i32, %c0_i32_0 : i32, i32
  }
  func.func @transform_5(%arg0: i32) -> (i32, i32) {
    %c0_i32 = arith.constant 0 : i32
    %c0_i32_0 = arith.constant 0 : i32
    %c0_i32_1 = arith.constant 0 : i32
    return %c0_i32, %c0_i32_0 : i32, i32
  }
  func.func @transform_6(%arg0: i32) -> (i32, i32) {
    %c0_i32 = arith.constant 0 : i32
    %c0_i32_0 = arith.constant 0 : i32
    %c0_i32_1 = arith.constant 0 : i32
    return %c0_i32, %c0_i32_0 : i32, i32
  }
  func.func @transform_7(%arg0: i32) -> (i32, i32) {
    %c0_i32 = arith.constant 0 : i32
    %c0_i32_0 = arith.constant 0 : i32
    %c0_i32_1 = arith.constant 0 : i32
    return %c0_i32, %c0_i32_0 : i32, i32
  }
  func.func @transform_8(%arg0: i32) -> (i32, i32) {
    %c0_i32 = arith.constant 0 : i32
    %c0_i32_0 = arith.constant 0 : i32
    %c0_i32_1 = arith.constant 0 : i32
    return %c0_i32, %c0_i32_0 : i32, i32
  }
  func.func @transform_9(%arg0: i32) -> (i32, i32) {
    %c0_i32 = arith.constant 0 : i32
    %c0_i32_0 = arith.constant 0 : i32
    return %arg0, %c0_i32 : i32, i32
  }
}

</mosaic_0001>

<bundles_post_ra>
// kernel: tpu_custom_call.1
= control target key start
LH: loop header
LB: loop body
LE: loop exit
PB: predicated region body
PF: predicated region fallthrough
CT: control target
= control target key end

     0   :  { %s638_s11 = smov 0   ;;  %s704_s0 = inlined_call_operand.vmem [shape: f32[64,16], index: 0, kind: input, shape index: {}]   ;;  %s705_s1 = inlined_call_operand.vmem [shape: f32[16,24], index: 1, kind: input, shape index: {}]   ;;  %s706_s2 = inlined_call_operand.vmem [shape: f32[1,24], index: 2, kind: input, shape index: {}]   ;;  %s707_s3 = inlined_call_operand.vmem [shape: f32[24,24], index: 3, kind: input, shape index: {}]   ;;  %s708_s4 = inlined_call_operand.vmem [shape: f32[1,24], index: 4, kind: input, shape index: {}]   ;;  %s709_s5 = inlined_call_operand.vmem [shape: f32[24,24], index: 5, kind: input, shape index: {}]   ;;  %s710_s6 = inlined_call_operand.vmem [shape: f32[1,24], index: 6, kind: input, shape index: {}]   ;;  %s711_s7 = inlined_call_operand.vmem [shape: f32[1,24], index: 7, kind: input, shape index: {}]   ;;  %s712_s8 = inlined_call_operand.<no memory space> [shape: f32[1,1], index: 8, kind: input, shape index: {}]   ;;  %s713_s9 = inlined_call_operand.vmem [shape: f32[64,1], index: 9, kind: output, shape index: {}]  }
   0x1   :  { %v14_v0 = vstv %s712_s8 }
   0x2   :  { %15 = vst [vmem:[#allocation2] sm:$0x1] %v14_v0 }
   0x3 LB: > { %s532_s12 = sadd.s32 4294967295, %s583_s11   ;;  %p536_p0 = scmp.ge.s32.totalorder %s583_s11, 1  ;;  %s583_s11 = sphi %s638_s11, %s21_s11  }
   0x4   : > { %p290_p1 = scmp.lt.s32.totalorder %s583_s11, 5 }
   0x6   : > { %p291_p2 = pnand %p536_p0, %p290_p1 }
   0x7   : > { %s537_s16 = sshll.u32 (!%p291_p2), %s532_s12, 1 }
   0x8   : > { %294 = sbr.rel (%p291_p2) target bundleno = 564 (0x234), region = 56  ;;  %p327_p3 = scmp.lt.s32.totalorder (!%p291_p2), %s537_s16, 7 }
   0xd   : > { %v341_v1 = vld [vmem:[%s705_s1 + $0x8] sm:$0xff]  ;;  %v340_v2 = vld [vmem:[%s705_s1] sm:$0xff]  ;;  %s715_s16 = smov (!%p327_p3, %s537_s16), 7  ;;  %vm346_vm0 = vcmask 130048   ;;  %v380_v5 = vld [vmem:[%s707_s3 + $0x10] sm:$0xff]  ;;  %vm385_vm1 = vcmask 195584  }
   0xe   : > { %367 = vmatpush.msra.mxu0 %v341_v1  ;;  %s538_s17 = sshll.u32 %s715_s16, 3  ;;  %v379_v6 = vld [vmem:[%s707_s3 + $0x8] sm:$0xff]  ;;  %405 = vmatpush.msra.mxu1 %v380_v5  ;;  %v378_v7 = vld [vmem:[%s707_s3] sm:$0xff]  ;;  %v419_v15 = vld [vmem:[%s709_s5 + $0x10] sm:$0xff]  ;;  %vm473_vm2 = vcmask 7168  }
   0xf   : > { %s330_s20 = scalar_lea.vmem %s704_s0, %s538_s17  ;;  %549 = vmatpush.msra.mxu3 %v380_v5  ;;  %v560_v8 = vld [vmem:[%s706_s2] ss:$0 sm:$0xff]  ;;  %v418_v16 = vld [vmem:[%s709_s5 + $0x8] sm:$0xff]  ;;  %443 = vmatpush.msra.mxu2 %v419_v15  ;;  %s336_s24 = scalar_lea.vmem %s713_s9, %s538_s17 }
  0x10   : > { %368 = vmatpush.msra.mxu0 %v340_v2  ;;  %v338_v3 = vld [vmem:[%s330_s20] sm:$0xff]  ;;  %v339_v4 = vld [vmem:[%s330_s20 + $0x8] sm:$0xff]  ;;  %406 = vmatpush.msra.mxu1 %v379_v6 }
  0x11   : > { %541 = vmatmul.msk.f32.vlgmr.msra.gmra.mxu0 %vm346_vm0, %v338_v3  ;;  %550 = vmatpush.msra.mxu3 %v379_v6  ;;  %v417_v17 = vld [vmem:[%s709_s5] sm:$0xff] }
  0x12   : > { %407 = vmatpush.msra.mxu1 %v378_v7  ;;  %444 = vmatpush.msra.mxu2 %v418_v16  ;;  %v561_v18 = vld [vmem:[%s708_s4] ss:$0 sm:$0xff] }
  0x13   : > { %551 = vmatpush.msra.mxu3 %v378_v7  ;;  %v562_v25 = vld [vmem:[%s710_s6] ss:$0 sm:$0xff] }
  0x14   : > { %445 = vmatpush.msra.mxu2 %v417_v17  ;;  %v563_v28 = vld [vmem:[%s711_s7] ss:$0 sm:$0xff] }
  0x15   : > { %v564_v37 = vld [vmem:[#allocation2] ss:$0 sm:$0xff] }
  0x19   : > { %542 = vmatmul.msk.f32.gmra.mxu0 %vm346_vm0, %v339_v4 }
  0x8e   : > { %v370_v9 = vpop.f32.mrf.mxu0 }
  0x8f   : > { %v371_v10 = vadd.f32 %v560_v8, %v370_v9 }
  0x91   : > { %565 = vtanh.f32 %v371_v10 }
  0x96   : > { %v373_v11 = vpop.f32.mrf.mxu0 }
  0x97   : > { %v566_v12 = vpop.eup %565  ;;  %v374_v13 = vadd.f32 %v560_v8, %v373_v11 }
  0x98   : > { %543 = vmatmul.msk.f32.vlgmr.msra.gmra.mxu1 %vm385_vm1, %v566_v12 }
  0x99   : > { %567 = vtanh.f32 %v374_v13 }
  0x9f   : > { %v568_v14 = vpop.eup %567 }
  0xa0   : > { %544 = vmatmul.msk.f32.vlgmr.msra.gmra.mxu3 %vm385_vm1, %v568_v14 }
 0x115   : > { %v409_v19 = vpop.f32.mrf.mxu1 }
 0x116   : > { %v410_v20 = vadd.f32 %v561_v18, %v409_v19 }
 0x118   : > { %569 = vtanh.f32 %v410_v20 }
 0x11e   : > { %v570_v21 = vpop.eup %569 }
 0x11f   : > { %545 = vmatmul.msk.f32.vlgmr.msra.gmra.mxu2 %vm385_vm1, %v570_v21 }
 0x123   : > { %v412_v22 = vpop.f32.mrf.mxu3 }
 0x124   : > { %v413_v23 = vadd.f32 %v561_v18, %v412_v22 }
 0x126   : > { %571 = vtanh.f32 %v413_v23 }
 0x12c   : > { %v572_v24 = vpop.eup %571 }
 0x12d   : > { %546 = vmatmul.msk.f32.gmra.mxu2 %vm385_vm1, %v572_v24 }
 0x1a2   : > { %v447_v26 = vpop.f32.mrf.mxu2 }
 0x1a3   : > { %v448_v27 = vadd.f32 %v562_v25, %v447_v26 }
 0x1a5   : > { %573 = vtanh.f32 %v448_v27 }
 0x1ab   : > { %v574_v29 = vpop.eup %573 }
 0x1ac   : > { %v459_v30 = vmul.f32 %v574_v29, %v563_v28 }
 0x1ae   : > { %v461_v31 = vsel %vm385_vm1, %v459_v30, 0.0 }
 0x1af   : > { %462 = vadd.xlane.f32.xlu0 %v461_v31 }
 0x1b0   : > { %v450_v32 = vpop.f32.mrf.mxu2 }
 0x1b1   : > { %v451_v33 = vadd.f32 %v562_v25, %v450_v32 }
 0x1b3   : > { %575 = vtanh.f32 %v451_v33 }
 0x1b9   : > { %v576_v34 = vpop.eup %575 }
 0x1ba   : > { %v460_v35 = vmul.f32 %v576_v34, %v563_v28 }
 0x1bc   : > { %v464_v36 = vsel %vm385_vm1, %v460_v35, 0.0 }
 0x1bd   : > { %465 = vadd.xlane.f32.xlu0 %v464_v36 }
 0x222   : > { %v463_v38 = vpop.xlane.xlu0 %462 }
 0x223   : > { %v471_v39 = vadd.f32 %v564_v37, %v463_v38 }
 0x225   : > { %474 = vst.msk [vmem:[%s336_s24] sm:$0xff] %vm473_vm2, %v471_v39 }
 0x230   : > { %v466_v40 = vpop.xlane.xlu0 %465 }
 0x231   : > { %v472_v41 = vadd.f32 %v564_v37, %v466_v40 }
 0x233   : > { %475 = vst.msk [vmem:[%s336_s24 + $0x8] sm:$0xff] %vm473_vm2, %v472_v41 }
 0x234 PF: > { %s21_s11 = sadd.s32 1, %s583_s11  }
 0x235   : > { %p18_p4 = scmp.ge.s32.totalorder %s21_s11, 6  }
 0x237   :  { %20 = sbr.rel (!%p18_p4) target bundleno = 3 (0x3), region = 86 }

</bundles_post_ra>
